<compile_context>
chip_gen: v6e
topology: v6e:2x2x1
jax: 0.10.0
libtpu: 0.0.40
codegen_flags: <defaults>
</compile_context>

<pallas_src>
import functools

import jax
import jax.numpy as jnp
from jax.experimental import pallas as pl
from jax.experimental.pallas import tpu as pltpu

# ---- hyperparameters from the reference script ----
BLOCK_SIZE = 32
N_EMB = 64
NUM_HEADS = 4                      # num_heads * head_size must equal n_emb
HEAD_SIZE = N_EMB // NUM_HEADS     # 16

_B_TILE_CAP = 64                   # max batch rows per grid step


def mha_kernel(x_ref, wqkv_ref, wp_ref, bp_ref, o_ref, *, num_heads):
    """One batch tile of MultiHeadAttention.

    x_ref    : (Bb, T, C)   activations
    wqkv_ref : (C, 3*C)     packed [Wq | Wk | Wv], head-major columns inside each
                            block; the reference C**-0.5 scale is pre-folded into Wq.
    wp_ref   : (C, C)       output projection (proj.weight.T, head-major rows)
    bp_ref   : (1, C)       output projection bias
    o_ref    : (Bb, T, C)
    """
    Bb, T, C = x_ref.shape
    H = num_heads
    D = C // H
    f32 = jnp.float32

    # (Bb, T, C) -> (Bb*T, C): leading-dim merge only -> no relayout.
    x = x_ref[...].reshape(Bb * T, C).astype(f32)

    # Fused dense QKV projection: one (Bb*T, C) @ (C, 3C) MXU matmul.
    qkv = jnp.dot(x, wqkv_ref[...], preferred_element_type=f32)          # (Bb*T, 3C)

    # Causal (tril) mask as an additive bias, built once and shared by all heads.
    row = jax.lax.broadcasted_iota(jnp.int32, (T, T), 0)
    col = jax.lax.broadcasted_iota(jnp.int32, (T, T), 1)
    mask_bias = jnp.where(row >= col, 0.0, -1e30).astype(f32)            # (T, T)

    qk_dims = (((2,), (2,)), ((0,), (0,)))    # q @ k^T, batched over Bb
    pv_dims = (((2,), (1,)), ((0,), (0,)))    # p @ v,   batched over Bb

    # Per-(batch, head) attention math.  The (T,T)/(T,D) blocks are inherently
    # per-head, so this static unroll over H=4 only slices activations, never weights.
    head_outs = []
    for h in range(H):
        q = qkv[:, 0 * C + h * D: 0 * C + (h + 1) * D].reshape(Bb, T, D)   # pre-scaled
        k = qkv[:, 1 * C + h * D: 1 * C + (h + 1) * D].reshape(Bb, T, D)
        v = qkv[:, 2 * C + h * D: 2 * C + (h + 1) * D].reshape(Bb, T, D)

        s = jax.lax.dot_general(q, k, qk_dims, preferred_element_type=f32)  # (Bb,T,T)
        s = s + mask_bias
        s = s - jnp.max(s, axis=-1, keepdims=True)
        p = jnp.exp(s)
        p = p / jnp.sum(p, axis=-1, keepdims=True)   # exact softmax normalization

        head_outs.append(
            jax.lax.dot_general(p, v, pv_dims, preferred_element_type=f32))  # (Bb,T,D)

    # concat heads along lanes -> (Bb, T, C); merge leading dims (free) -> (Bb*T, C)
    o_cat = jnp.concatenate(head_outs, axis=-1).reshape(Bb * T, C)

    # Output projection as ONE dense MXU matmul; the head-sum lives in the contraction.
    y = jnp.dot(o_cat, wp_ref[...], preferred_element_type=f32) + bp_ref[...]
    o_ref[...] = y.reshape(Bb, T, C).astype(o_ref.dtype)


def _batch_tiling(B):
    """Pick (batch_tile, grid_steps).

    >= 2 grid steps whenever B >= 2 (so both v7x TensorCores get work with the
    "parallel" batch axis); tiles capped at _B_TILE_CAP rows so the ~0.35us
    per-step pipeline overhead is amortized; ceil-div so awkward/prime B still
    get large tiles (the partial tail block is masked by Pallas).
    """
    if B <= 1:
        return 1, 1
    num_steps = max(2, pl.cdiv(B, _B_TILE_CAP))
    b_tile = pl.cdiv(B, num_steps)
    return b_tile, pl.cdiv(B, b_tile)


@functools.partial(jax.jit, static_argnames=("num_heads",))
def multihead_attention(x, params, *, num_heads=NUM_HEADS):
    B, T, C = x.shape
    wqkv, wp, bp = params["wqkv"], params["wp"], params["bp"]
    assert wqkv.shape == (C, 3 * C) and wp.shape == (C, C) and C % num_heads == 0

    b_tile, steps = _batch_tiling(B)
    # Weights / bias: whole array, grid-constant, resident in VMEM (no per-step re-blocking).
    vmem_spec = pl.BlockSpec(memory_space=pltpu.MemorySpace.VMEM)

    kernel = functools.partial(mha_kernel, num_heads=num_heads)
    return pl.pallas_call(
        kernel,
        out_shape=jax.ShapeDtypeStruct((B, T, C), x.dtype),
        grid=(steps,),
        in_specs=[
            pl.BlockSpec((b_tile, T, C), lambda i: (i, 0, 0)),   # activations
            vmem_spec, vmem_spec, vmem_spec,                     # packed weights / bias
        ],
        out_specs=pl.BlockSpec((b_tile, T, C), lambda i: (i, 0, 0)),
        compiler_params=pltpu.CompilerParams(dimension_semantics=("parallel",)),
    )(x, wqkv, wp, bp)


def init_params(key, n_emb=N_EMB, num_heads=NUM_HEADS, head_size=HEAD_SIZE):
    """Per-head parameters mirroring the PyTorch module.

    wq[h] == Head_h.query.weight.T (n_emb, head_size); wp[h] == proj.weight.T[h*D:(h+1)*D].
    """
    k1, k2, k3, k4 = jax.random.split(key, 4)
    std = n_emb ** -0.5
    f32 = jnp.float32
    return dict(
        wq=jax.random.normal(k1, (num_heads, n_emb, head_size), f32) * std,
        wk=jax.random.normal(k2, (num_heads, n_emb, head_size), f32) * std,
        wv=jax.random.normal(k3, (num_heads, n_emb, head_size), f32) * std,
        wp=jax.random.normal(k4, (num_heads, head_size, n_emb), f32) * std,
        bp=jnp.zeros((1, n_emb), f32),
    )


def pack_params(params):
    """One-time host-side packing for the kernel.

    wqkv: (C, 3*H*D) = [Wq | Wk | Wv], head-major columns, with the reference's
          C**-0.5 attention scale (C = n_emb quirk) folded into the Wq block.
    wp  : (H*D, C)   = proj.weight.T with head-major rows (matches the concat order).
    """
    wq, wk, wv = params["wq"], params["wk"], params["wv"]        # (H, C, D)
    H, C, D = wq.shape
    scale = jnp.asarray(C ** -0.5, jnp.float32)                  # deliberate reference quirk
    to2d = lambda w: jnp.transpose(w, (1, 0, 2)).reshape(C, H * D)
    wqkv = jnp.concatenate([to2d(wq) * scale, to2d(wk), to2d(wv)], axis=1)
    return dict(wqkv=wqkv, wp=params["wp"].reshape(H * D, C), bp=params["bp"])


def mha_reference(x, params):
    """Pure-JAX reference mirroring the PyTorch module (per-head math)."""
    wq, wk, wv = params["wq"], params["wk"], params["wv"]        # (H, C, D)
    wp, bp = params["wp"], params["bp"]                          # (H, D, C), (1, C)
    B, T, C = x.shape
    scale = C ** -0.5
    q = jnp.einsum("btc,hcd->bhtd", x, wq) * scale
    k = jnp.einsum("btc,hcd->bhtd", x, wk)
    v = jnp.einsum("btc,hcd->bhtd", x, wv)
    s = jnp.einsum("bhtd,bhsd->bhts", q, k)
    mask = jnp.tril(jnp.ones((T, T), bool))
    s = jnp.where(mask, s, -jnp.inf)
    p = jax.nn.softmax(s, axis=-1)
    o = jnp.einsum("bhts,bhsd->bhtd", p, v)
    return jnp.einsum("bhtd,hdc->btc", o, wp) + bp


if __name__ == "__main__":
    key = jax.random.PRNGKey(0)
    pkey, xkey = jax.random.split(key)
    params = init_params(pkey)
    packed = pack_params(params)          # host-side, one-time weight packing

    B, T = 2, 8                           # T <= block_size (32)
    x = jax.random.normal(xkey, (B, T, N_EMB), jnp.float32)

    out = multihead_attention(x, packed)
    jax.block_until_ready(out)

    assert out.shape == (B, T, N_EMB), out.shape
    assert bool(jnp.all(jnp.isfinite(out)))

    ref = mha_reference(x, params)
    max_err = float(jnp.max(jnp.abs(out - ref)))
    assert max_err < 1e-3, f"max abs err {max_err}"

    print("KERNEL_OK")
</pallas_src>

<mosaic_0001>
module attributes {stable_mosaic.version = 11 : i64} {
  func.func @mha_kernel(%arg0: i32, %arg1: memref<1x8x64xf32, #tpu.memory_space<vmem>>, %arg2: memref<64x192xf32, #tpu.memory_space<vmem>>, %arg3: memref<64x64xf32, #tpu.memory_space<vmem>>, %arg4: memref<1x64xf32, #tpu.memory_space<vmem>>, %arg5: memref<1x8x64xf32, #tpu.memory_space<vmem>>) attributes {dimension_semantics = [#tpu.dimension_semantics<parallel>], iteration_bounds = array<i64: 2>, scalar_prefetch = 0 : i64, scratch_operands = 0 : i64, tpu.core_type = #tpu.core_type<tc>, window_params = [{transform_indices = @transform_0, window_bounds = array<i64: 1, 8, 64>}, {pipeline_mode = #tpu.pipeline_mode<synchronous>, transform_indices = @transform_1, window_bounds = array<i64: 64, 192>}, {pipeline_mode = #tpu.pipeline_mode<synchronous>, transform_indices = @transform_2, window_bounds = array<i64: 64, 64>}, {pipeline_mode = #tpu.pipeline_mode<synchronous>, transform_indices = @transform_3, window_bounds = array<i64: 1, 64>}, {transform_indices = @transform_4, window_bounds = array<i64: 1, 8, 64>}]} {
    %c0 = arith.constant 0 : index
    %c0_0 = arith.constant 0 : index
    %c0_1 = arith.constant 0 : index
    %0 = vector.load %arg1[%c0, %c0_0, %c0_1] : memref<1x8x64xf32, #tpu.memory_space<vmem>>, vector<1x8x64xf32>
    %1 = vector.shape_cast %0 : vector<1x8x64xf32> to vector<8x64xf32>
    %c0_2 = arith.constant 0 : index
    %c0_3 = arith.constant 0 : index
    %2 = vector.load %arg2[%c0_2, %c0_3] : memref<64x192xf32, #tpu.memory_space<vmem>>, vector<64x192xf32>
    %cst = arith.constant dense<0.000000e+00> : vector<8x192xf32>
    %3 = tpu.matmul %1, %2, %cst {dimension_numbers = #tpu.dot_dimension_numbers<[1], [0], [0], [1], [0, 0, 1, 1], [], []>} : vector<8x64xf32>, vector<64x192xf32>, vector<8x192xf32> -> vector<8x192xf32>
    %4 = tpu.iota {dimensions = array<i32: 0>} : vector<8x8xi32>
    %5 = tpu.iota {dimensions = array<i32: 1>} : vector<8x8xi32>
    %6 = arith.cmpi sge, %4, %5 : vector<8x8xi32>
    %cst_4 = arith.constant 0.000000e+00 : f32
    %cst_5 = arith.constant -1.000000e+30 : f32
    %7 = vector.broadcast %cst_4 : f32 to vector<8x8xf32>
    %8 = vector.broadcast %cst_5 : f32 to vector<8x8xf32>
    %9 = arith.select %6, %7, %8 : vector<8x8xi1>, vector<8x8xf32>
    %10 = vector.extract_strided_slice %3 {offsets = [0, 0], sizes = [8, 16], strides = [1, 1]} : vector<8x192xf32> to vector<8x16xf32>
    %11 = vector.shape_cast %10 : vector<8x16xf32> to vector<1x8x16xf32>
    %12 = vector.extract_strided_slice %3 {offsets = [0, 64], sizes = [8, 16], strides = [1, 1]} : vector<8x192xf32> to vector<8x16xf32>
    %13 = vector.shape_cast %12 : vector<8x16xf32> to vector<1x8x16xf32>
    %14 = vector.extract_strided_slice %3 {offsets = [0, 128], sizes = [8, 16], strides = [1, 1]} : vector<8x192xf32> to vector<8x16xf32>
    %15 = vector.shape_cast %14 : vector<8x16xf32> to vector<1x8x16xf32>
    %cst_6 = arith.constant dense<0.000000e+00> : vector<1x8x8xf32>
    %16 = tpu.matmul %11, %13, %cst_6 {dimension_numbers = #tpu.dot_dimension_numbers<[2], [2], [1], [1], [0, 0, 0, 1, 1, 1], [0], [0]>} : vector<1x8x16xf32>, vector<1x8x16xf32>, vector<1x8x8xf32> -> vector<1x8x8xf32>
    %17 = vector.shape_cast %9 : vector<8x8xf32> to vector<1x8x8xf32>
    %18 = arith.addf %16, %17 : vector<1x8x8xf32>
    %cst_7 = arith.constant dense<0xFF800000> : vector<1x8xf32>
    %19 = vector.multi_reduction <maximumf>, %18, %cst_7 [2] : vector<1x8x8xf32> to vector<1x8xf32>
    %20 = vector.shape_cast %19 : vector<1x8xf32> to vector<1x8x1xf32>
    %21 = vector.broadcast %20 : vector<1x8x1xf32> to vector<1x8x8xf32>
    %22 = arith.subf %18, %21 : vector<1x8x8xf32>
    %23 = math.exp %22 : vector<1x8x8xf32>
    %cst_8 = arith.constant dense<0.000000e+00> : vector<1x8xf32>
    %24 = vector.multi_reduction <add>, %23, %cst_8 [2] : vector<1x8x8xf32> to vector<1x8xf32>
    %25 = vector.shape_cast %24 : vector<1x8xf32> to vector<1x8x1xf32>
    %26 = vector.broadcast %25 : vector<1x8x1xf32> to vector<1x8x8xf32>
    %27 = arith.divf %23, %26 : vector<1x8x8xf32>
    %cst_9 = arith.constant dense<0.000000e+00> : vector<1x8x16xf32>
    %28 = tpu.matmul %27, %15, %cst_9 {dimension_numbers = #tpu.dot_dimension_numbers<[2], [1], [1], [2], [0, 0, 0, 1, 1, 2], [0], [0]>} : vector<1x8x8xf32>, vector<1x8x16xf32>, vector<1x8x16xf32> -> vector<1x8x16xf32>
    %29 = vector.extract_strided_slice %3 {offsets = [0, 16], sizes = [8, 16], strides = [1, 1]} : vector<8x192xf32> to vector<8x16xf32>
    %30 = vector.shape_cast %29 : vector<8x16xf32> to vector<1x8x16xf32>
    %31 = vector.extract_strided_slice %3 {offsets = [0, 80], sizes = [8, 16], strides = [1, 1]} : vector<8x192xf32> to vector<8x16xf32>
    %32 = vector.shape_cast %31 : vector<8x16xf32> to vector<1x8x16xf32>
    %33 = vector.extract_strided_slice %3 {offsets = [0, 144], sizes = [8, 16], strides = [1, 1]} : vector<8x192xf32> to vector<8x16xf32>
    %34 = vector.shape_cast %33 : vector<8x16xf32> to vector<1x8x16xf32>
    %cst_10 = arith.constant dense<0.000000e+00> : vector<1x8x8xf32>
    %35 = tpu.matmul %30, %32, %cst_10 {dimension_numbers = #tpu.dot_dimension_numbers<[2], [2], [1], [1], [0, 0, 0, 1, 1, 1], [0], [0]>} : vector<1x8x16xf32>, vector<1x8x16xf32>, vector<1x8x8xf32> -> vector<1x8x8xf32>
    %36 = vector.shape_cast %9 : vector<8x8xf32> to vector<1x8x8xf32>
    %37 = arith.addf %35, %36 : vector<1x8x8xf32>
    %cst_11 = arith.constant dense<0xFF800000> : vector<1x8xf32>
    %38 = vector.multi_reduction <maximumf>, %37, %cst_11 [2] : vector<1x8x8xf32> to vector<1x8xf32>
    %39 = vector.shape_cast %38 : vector<1x8xf32> to vector<1x8x1xf32>
    %40 = vector.broadcast %39 : vector<1x8x1xf32> to vector<1x8x8xf32>
    %41 = arith.subf %37, %40 : vector<1x8x8xf32>
    %42 = math.exp %41 : vector<1x8x8xf32>
    %cst_12 = arith.constant dense<0.000000e+00> : vector<1x8xf32>
    %43 = vector.multi_reduction <add>, %42, %cst_12 [2] : vector<1x8x8xf32> to vector<1x8xf32>
    %44 = vector.shape_cast %43 : vector<1x8xf32> to vector<1x8x1xf32>
    %45 = vector.broadcast %44 : vector<1x8x1xf32> to vector<1x8x8xf32>
    %46 = arith.divf %42, %45 : vector<1x8x8xf32>
    %cst_13 = arith.constant dense<0.000000e+00> : vector<1x8x16xf32>
    %47 = tpu.matmul %46, %34, %cst_13 {dimension_numbers = #tpu.dot_dimension_numbers<[2], [1], [1], [2], [0, 0, 0, 1, 1, 2], [0], [0]>} : vector<1x8x8xf32>, vector<1x8x16xf32>, vector<1x8x16xf32> -> vector<1x8x16xf32>
    %48 = vector.extract_strided_slice %3 {offsets = [0, 32], sizes = [8, 16], strides = [1, 1]} : vector<8x192xf32> to vector<8x16xf32>
    %49 = vector.shape_cast %48 : vector<8x16xf32> to vector<1x8x16xf32>
    %50 = vector.extract_strided_slice %3 {offsets = [0, 96], sizes = [8, 16], strides = [1, 1]} : vector<8x192xf32> to vector<8x16xf32>
    %51 = vector.shape_cast %50 : vector<8x16xf32> to vector<1x8x16xf32>
    %52 = vector.extract_strided_slice %3 {offsets = [0, 160], sizes = [8, 16], strides = [1, 1]} : vector<8x192xf32> to vector<8x16xf32>
    %53 = vector.shape_cast %52 : vector<8x16xf32> to vector<1x8x16xf32>
    %cst_14 = arith.constant dense<0.000000e+00> : vector<1x8x8xf32>
    %54 = tpu.matmul %49, %51, %cst_14 {dimension_numbers = #tpu.dot_dimension_numbers<[2], [2], [1], [1], [0, 0, 0, 1, 1, 1], [0], [0]>} : vector<1x8x16xf32>, vector<1x8x16xf32>, vector<1x8x8xf32> -> vector<1x8x8xf32>
    %55 = vector.shape_cast %9 : vector<8x8xf32> to vector<1x8x8xf32>
    %56 = arith.addf %54, %55 : vector<1x8x8xf32>
    %cst_15 = arith.constant dense<0xFF800000> : vector<1x8xf32>
    %57 = vector.multi_reduction <maximumf>, %56, %cst_15 [2] : vector<1x8x8xf32> to vector<1x8xf32>
    %58 = vector.shape_cast %57 : vector<1x8xf32> to vector<1x8x1xf32>
    %59 = vector.broadcast %58 : vector<1x8x1xf32> to vector<1x8x8xf32>
    %60 = arith.subf %56, %59 : vector<1x8x8xf32>
    %61 = math.exp %60 : vector<1x8x8xf32>
    %cst_16 = arith.constant dense<0.000000e+00> : vector<1x8xf32>
    %62 = vector.multi_reduction <add>, %61, %cst_16 [2] : vector<1x8x8xf32> to vector<1x8xf32>
    %63 = vector.shape_cast %62 : vector<1x8xf32> to vector<1x8x1xf32>
    %64 = vector.broadcast %63 : vector<1x8x1xf32> to vector<1x8x8xf32>
    %65 = arith.divf %61, %64 : vector<1x8x8xf32>
    %cst_17 = arith.constant dense<0.000000e+00> : vector<1x8x16xf32>
    %66 = tpu.matmul %65, %53, %cst_17 {dimension_numbers = #tpu.dot_dimension_numbers<[2], [1], [1], [2], [0, 0, 0, 1, 1, 2], [0], [0]>} : vector<1x8x8xf32>, vector<1x8x16xf32>, vector<1x8x16xf32> -> vector<1x8x16xf32>
    %67 = vector.extract_strided_slice %3 {offsets = [0, 48], sizes = [8, 16], strides = [1, 1]} : vector<8x192xf32> to vector<8x16xf32>
    %68 = vector.shape_cast %67 : vector<8x16xf32> to vector<1x8x16xf32>
    %69 = vector.extract_strided_slice %3 {offsets = [0, 112], sizes = [8, 16], strides = [1, 1]} : vector<8x192xf32> to vector<8x16xf32>
    %70 = vector.shape_cast %69 : vector<8x16xf32> to vector<1x8x16xf32>
    %71 = vector.extract_strided_slice %3 {offsets = [0, 176], sizes = [8, 16], strides = [1, 1]} : vector<8x192xf32> to vector<8x16xf32>
    %72 = vector.shape_cast %71 : vector<8x16xf32> to vector<1x8x16xf32>
    %cst_18 = arith.constant dense<0.000000e+00> : vector<1x8x8xf32>
    %73 = tpu.matmul %68, %70, %cst_18 {dimension_numbers = #tpu.dot_dimension_numbers<[2], [2], [1], [1], [0, 0, 0, 1, 1, 1], [0], [0]>} : vector<1x8x16xf32>, vector<1x8x16xf32>, vector<1x8x8xf32> -> vector<1x8x8xf32>
    %74 = vector.shape_cast %9 : vector<8x8xf32> to vector<1x8x8xf32>
    %75 = arith.addf %73, %74 : vector<1x8x8xf32>
    %cst_19 = arith.constant dense<0xFF800000> : vector<1x8xf32>
    %76 = vector.multi_reduction <maximumf>, %75, %cst_19 [2] : vector<1x8x8xf32> to vector<1x8xf32>
    %77 = vector.shape_cast %76 : vector<1x8xf32> to vector<1x8x1xf32>
    %78 = vector.broadcast %77 : vector<1x8x1xf32> to vector<1x8x8xf32>
    %79 = arith.subf %75, %78 : vector<1x8x8xf32>
    %80 = math.exp %79 : vector<1x8x8xf32>
    %cst_20 = arith.constant dense<0.000000e+00> : vector<1x8xf32>
    %81 = vector.multi_reduction <add>, %80, %cst_20 [2] : vector<1x8x8xf32> to vector<1x8xf32>
    %82 = vector.shape_cast %81 : vector<1x8xf32> to vector<1x8x1xf32>
    %83 = vector.broadcast %82 : vector<1x8x1xf32> to vector<1x8x8xf32>
    %84 = arith.divf %80, %83 : vector<1x8x8xf32>
    %cst_21 = arith.constant dense<0.000000e+00> : vector<1x8x16xf32>
    %85 = tpu.matmul %84, %72, %cst_21 {dimension_numbers = #tpu.dot_dimension_numbers<[2], [1], [1], [2], [0, 0, 0, 1, 1, 2], [0], [0]>} : vector<1x8x8xf32>, vector<1x8x16xf32>, vector<1x8x16xf32> -> vector<1x8x16xf32>
    %86 = tpu.concatenate %28, %47, %66, %85 in 2 : vector<1x8x16xf32>, vector<1x8x16xf32>, vector<1x8x16xf32>, vector<1x8x16xf32> -> vector<1x8x64xf32>
    %87 = vector.shape_cast %86 : vector<1x8x64xf32> to vector<8x64xf32>
    %c0_22 = arith.constant 0 : index
    %c0_23 = arith.constant 0 : index
    %88 = vector.load %arg3[%c0_22, %c0_23] : memref<64x64xf32, #tpu.memory_space<vmem>>, vector<64x64xf32>
    %cst_24 = arith.constant dense<0.000000e+00> : vector<8x64xf32>
    %89 = tpu.matmul %87, %88, %cst_24 {dimension_numbers = #tpu.dot_dimension_numbers<[1], [0], [0], [1], [0, 0, 1, 1], [], []>} : vector<8x64xf32>, vector<64x64xf32>, vector<8x64xf32> -> vector<8x64xf32>
    %c0_25 = arith.constant 0 : index
    %c0_26 = arith.constant 0 : index
    %90 = vector.load %arg4[%c0_25, %c0_26] : memref<1x64xf32, #tpu.memory_space<vmem>>, vector<1x64xf32>
    %91 = vector.broadcast %90 : vector<1x64xf32> to vector<8x64xf32>
    %92 = arith.addf %89, %91 : vector<8x64xf32>
    %93 = vector.shape_cast %92 : vector<8x64xf32> to vector<1x8x64xf32>
    %c0_27 = arith.constant 0 : index
    %c0_28 = arith.constant 0 : index
    %c0_29 = arith.constant 0 : index
    %94 = vector.load %arg5[%c0_27, %c0_28, %c0_29] : memref<1x8x64xf32, #tpu.memory_space<vmem>>, vector<1x8x64xf32>
    tpu.vector_store %arg5[%c0_27, %c0_28, %c0_29], %93 {strides = array<i32>} : memref<1x8x64xf32, #tpu.memory_space<vmem>>, vector<1x8x64xf32>,
    return
  }
  func.func @transform_0(%arg0: i32) -> (i32, i32, i32) {
    %c0_i32 = arith.constant 0 : i32
    %c0_i32_0 = arith.constant 0 : i32
    %c0_i32_1 = arith.constant 0 : i32
    return %arg0, %c0_i32, %c0_i32_0 : i32, i32, i32
  }
  func.func @transform_1(%arg0: i32) -> (i32, i32) {
    %c0_i32 = arith.constant 0 : i32
    %c0_i32_0 = arith.constant 0 : i32
    %c0_i32_1 = arith.constant 0 : i32
    return %c0_i32, %c0_i32_0 : i32, i32
  }
  func.func @transform_2(%arg0: i32) -> (i32, i32) {
    %c0_i32 = arith.constant 0 : i32
    %c0_i32_0 = arith.constant 0 : i32
    %c0_i32_1 = arith.constant 0 : i32
    return %c0_i32, %c0_i32_0 : i32, i32
  }
  func.func @transform_3(%arg0: i32) -> (i32, i32) {
    %c0_i32 = arith.constant 0 : i32
    %c0_i32_0 = arith.constant 0 : i32
    %c0_i32_1 = arith.constant 0 : i32
    return %c0_i32, %c0_i32_0 : i32, i32
  }
  func.func @transform_4(%arg0: i32) -> (i32, i32, i32) {
    %c0_i32 = arith.constant 0 : i32
    %c0_i32_0 = arith.constant 0 : i32
    %c0_i32_1 = arith.constant 0 : i32
    return %arg0, %c0_i32, %c0_i32_0 : i32, i32, i32
  }
}

</mosaic_0001>

<bundles_post_ra>
// kernel: multihead_attention.1
= control target key start
LH: loop header
LB: loop body
LE: loop exit
PB: predicated region body
PF: predicated region fallthrough
CT: control target
= control target key end

     0   :  { %9 = vsyncpa [#allocation3], 0  ;;  %s1886_s0 = inlined_call_operand.hbm [shape: f32[2,8,64], index: 0, kind: input, shape index: {}]   ;;  %s1887_s1 = inlined_call_operand.hbm [shape: f32[64,192], index: 1, kind: input, shape index: {}]   ;;  %s1888_s2 = inlined_call_operand.hbm [shape: f32[64,64], index: 2, kind: input, shape index: {}]   ;;  %s1889_s3 = inlined_call_operand.vmem [shape: f32[1,64], index: 3, kind: input, shape index: {}]   ;;  %s1890_s4 = inlined_call_operand.hbm [shape: f32[2,8,64], index: 4, kind: output, shape index: {}]  }
   0x1   :  { %11 = vsyncpa [#allocation3 + $0x1], 0 }
   0x2   :  { %12 = vsyncpa [#allocation6], 0 }
   0x3   :  { %13 = vsyncpa [#allocation4], 0 }
   0x4   :  { %15 = vsyncpa [#allocation4 + $0x1], 0  ;;  %s1613_s15 = smov 0   ;;  %s1615_s16 = smov 0  }
   0x5   :  { %s1617_s17 = smov 0   ;;  %s1619_s18 = smov 0  }
   0x6 LB: > { %s1634_s19 = sadd.s32 4294967295, %s1568_s18   ;;  %s1208_s20 = sadd.s32 4294967294, %s1568_s18   ;;  %s1568_s18 = sphi %s1619_s18, %s1912_s18   ;;  %s1564_s17 = sphi %s1617_s17, %s1911_s17   ;;  %s1560_s16 = sphi %s1615_s16, %s1910_s16   ;;  %s1556_s15 = sphi %s1613_s15, %s1909_s15  }
   0x7   : > { %p41_p0 = scmp.ne.s32.totalorder %s1560_s16, %s1556_s15  ;;  %p1891_p1 = scmp.eq.s32.totalorder %s1634_s19, 0 }
   0x8   : > { %p134_p3 = scmp.eq.s32.totalorder %s1208_s20, 1  ;;  %p1209_p5 = scmp.ge.s32.totalorder %s1568_s18, 1 }
   0x9   : > { %p1643_p4 = por %p1891_p1, %p41_p0  ;;  %p141_p7 = scmp.lt.s32.totalorder %s1568_s18, 3 }
   0xa   : > { %p1648_p6 = por %p134_p3, %p41_p0  ;;  %s1570_s24 = smov [#allocation5]  }
   0xb   : > { %s1895_s21 = scalar_select %p1643_p4, 1, 0 }
   0xc   : > { %s1896_s22 = scalar_select %p1648_p6, 1, 0 }
   0xd   : > { %p1653_p8 = pnand %p1209_p5, %p141_p7  ;;  %s153_s25 = sshll.u32 %s1570_s24, 4  ;;  %s154_s25 = int_to_ptr.vmem [resolvable:$true] %s153_s25 }
   0xe   : > { %s1571_s27 = smov [#allocation7]   ;;  %s1431_s29 = scalar_lea.vmem %s154_s25, 2048 }
   0xf   : > { %s1897_s23 = scalar_select %p1653_p8, 1, 0 }
  0x10   : > { %p1335_p9 = pneg %p1653_p8  ;;  %s166_s28 = sshll.u32 %s1571_s27, 4  ;;  %s167_s28 = int_to_ptr.vmem [resolvable:$true] %s166_s28 }
  0x11   : > { %p1432_p13 = scmp.ne.s32.totalorder %s154_s25, %s1431_s29  ;;  %p1439_p5 = scmp.lt.s32.totalorder %s154_s25, %s154_s25 }
  0x12   : > { %p1662_p11 = pnand %p1335_p9, %p1891_p1  ;;  %p1440_p7 = scmp.lt.s32.totalorder %s1431_s29, %s1431_s29 }
  0x14   : > { %p1422_p12 = pneg %p1662_p11  ;;  %p1441_p10 = por %p1440_p7, %p1439_p5 }
  0x16   : > { %p1434_p0 = pnand %p1432_p13, %p1422_p12 }
  0x18   : > { %p1435_p3 = pneg %p1434_p0 }
  0x1a   : > { %p1442_p9 = pnand %p1441_p10, %p1435_p3 }
  0x1c   : > { %1445 = shalt.err (!%p1442_p9)
}
  0x1d   : > { %s1572_s30 = smov 256   ;;  %s1573_s5 = smov 16  }
  0x1e   : > { %1338 = dma.hbm_to_vmem [thread:$0]  (!%p1662_p11), %s1887_s1, 2048, %s154_s25, [#allocation6], %s1572_s30, %s1572_s30, %s1573_s5  }
  0x1f   : > { %s1457_s8 = scalar_lea.vmem %s167_s28, 1024  ;;  %p1465_p2 = scmp.lt.s32.totalorder %s167_s28, %s167_s28 }
  0x20   : > { %p1458_p1 = scmp.ne.s32.totalorder %s167_s28, %s1457_s8  ;;  %p1466_p6 = scmp.lt.s32.totalorder %s1457_s8, %s1457_s8 }
  0x22   : > { %p1460_p13 = pnand %p1458_p1, %p1422_p12  ;;  %p1467_p5 = por %p1466_p6, %p1465_p2 }
  0x24   : > { %p1461_p0 = pneg %p1460_p13 }
  0x26   : > { %p1468_p10 = pnand %p1467_p5, %p1461_p0 }
  0x28   : > { %1471 = shalt.err (!%p1468_p10)
}
  0x29   : > { %s1574_s9 = smov 128   ;;  %s1575_s10 = smov 8  }
  0x2a   : > { %1341 = dma.hbm_to_vmem [thread:$0]  (!%p1662_p11), %s1888_s2, 1024, %s167_s28, [#allocation6], %s1574_s9, %s1574_s9, %s1575_s10  }
  0x2b   : > { %s1685_s13 = sadd.s32 1, %s1568_s18   ;;  %s28_s20 = sadd.s32 1, %s1564_s17 }
  0x2c   : > { %s25_s14 = ssub.s32 %s1568_s18, %s1685_s13  ;;  %p35_p2 = scmp.ne.s32.totalorder %s1564_s17, %s1560_s16 }
  0x2d   : > { %p26_p1 = scmp.eq.s32.totalorder %s25_s14, 0  ;;  %p36_p6 = scmp.eq.s32.totalorder %s1568_s18, 0 }
  0x2e   : > { %p1899_p3 = scmp.eq.s32.totalorder %s1634_s19, 1  ;;  %p1352_p9 = scmp.lt.s32.totalorder %s1568_s18, 2 }
  0x2f   : > { %s1694_s24 = scalar_select %p26_p1, %s1564_s17, %s28_s20  }
  0x30   : > { %p37_p12 = por %p36_p6, %p35_p2  ;;  %p1698_p7 = por %p1899_p3, %p35_p2 }
  0x31   : > { %s183_s26 = sand.u32 1, %s1564_s17   ;;  %s1214_s28 = sshll.u32 %s1568_s18, 7 }
  0x32   : > { %s1900_s25 = scalar_select %p1698_p7, 1, 0 }
  0x33   : > { %s1213_s27 = sshll.u32 %s183_s26, 3  ;;  %s1708_s5 = scalar_lea.hbm %s1886_s0, %s1214_s28 }
  0x34   : > { %s187_s6 = scalar_lea.vmem [#allocation2], %s1213_s27  ;;  %p1710_p11 = pnand %p1352_p9, %p37_p12 }
  0x35   : > { %s194_s7 = sshll.u32 %s187_s6, 4  ;;  %s184_s9 = scalar_lea.sflag [#allocation3], %s183_s26  ;;  %s195_s7 = int_to_ptr.vmem [resolvable:$true] %s194_s7 }
  0x36   : > { %s1472_s10 = scalar_lea.hbm %s1708_s5, 128  ;;  %p1474_p0 = pneg %p1710_p11 }
  0x37   : > { %p1473_p13 = scmp.ne.s32.totalorder %s1708_s5, %s1472_s10  ;;  %s1477_s14 = scalar_lea.hbm %s1886_s0, 256 }
  0x38   : > { %p1478_p1 = scmp.lt.s32.totalorder %s1708_s5, %s1886_s0  ;;  %p1479_p2 = scmp.lt.s32.totalorder %s1477_s14, %s1472_s10 }
  0x39   : > { %p1475_p5 = pnand %p1474_p0, %p1473_p13 }
  0x3a   : > { %p1480_p6 = por %p1479_p2, %p1478_p1 }
  0x3b   : > { %p1476_p10 = pneg %p1475_p5 }
  0x3d   : > { %p1481_p12 = pnand %p1480_p6, %p1476_p10 }
  0x3f   : > { %1484 = shalt.err (!%p1481_p12)
}
  0x40   : > { %s1485_s28 = scalar_lea.vmem %s195_s7, 128  ;;  %s1576_s26 = smov [#allocation2]  }
  0x41   : > { %p1486_p3 = scmp.ne.s32.totalorder %s195_s7, %s1485_s28  ;;  %s1490_s29 = sshll.u32 %s1576_s26, 4  ;;  %s1491_s29 = int_to_ptr.vmem [resolvable:$false] %s1490_s29 }
  0x42   : > { %s1492_s30 = scalar_lea.vmem %s1491_s29, 256  ;;  %p1493_p13 = scmp.lt.s32.totalorder %s195_s7, %s1491_s29 }
  0x43   : > { %p1488_p9 = pnand %p1486_p3, %p1474_p0  ;;  %p1494_p5 = scmp.lt.s32.totalorder %s1492_s30, %s1485_s28 }
  0x45   : > { %p1489_p7 = pneg %p1488_p9  ;;  %p1495_p4 = por %p1494_p5, %p1493_p13 }
  0x47   : > { %p1496_p8 = pnand %p1495_p4, %p1489_p7 }
  0x49   : > { %1499 = shalt.err (!%p1496_p8)
}
  0x4a   : > { %1345 = dma.hbm_to_vmem [thread:$0]  (!%p1710_p11), %s1708_s5, 128, %s195_s7, %s184_s9  }
  0x4b   : > { %p1902_p10 = scmp.ne.s32.totalorder %s1897_s23, 0 }
  0x4c   : > { %s1731_s6 = sand.u32 (!%p1902_p10), 1, %s1560_s16   ;;  %p1903_p4 = scmp.ne.s32.totalorder (!%p1902_p10), %s1895_s21, 0 }
  0x4d   : > { %203 = sbr.rel (%p1902_p10) target bundleno = 2972 (0xb9c), region = 36  ;;  %s1216_s10 = sshll.u32 (!%p1902_p10), %s1731_s6, 3 }
  0x4e   : > { %s206_s11 = scalar_lea.sflag (!%p1902_p10), [#allocation3], %s1731_s6  ;;  %s1737_s12 = scalar_lea.vmem (!%p1902_p10), [#allocation2], %s1216_s10 }
  0x52   : > { %1543 = dma.done.wait (%p1903_p4), %s206_s11, 128  }
  0x53   : > { %1545 = vsyncadd (%p1903_p4), %s206_s11, 4294967168  ;;  %p1904_p8 = scmp.eq.s32.totalorder %s1634_s19, 0 }
  0x55   : > { %1547 = dma.done.wait (%p1904_p8), [#allocation6], 3072   ;;  %p1905_p7 = pmov %p1904_p8 }
  0x56   : > { %v1577_v0 = vmov 0.0   ;;  %v258_v1 = vld [vmem:[#allocation5 + $0x78] sm:$0xff]  ;;  %v257_v2 = vld [vmem:[#allocation5 + $0x70] sm:$0xff]  ;;  %v256_v3 = vld [vmem:[#allocation5 + $0x68] sm:$0xff]  ;;  %vm259_vm0 = vcmask 523264   ;;  %vm1578_vm1 = vmmov 0   ;;  %v334_v21 = vlaneseq }
  0x57   : > { %1549 = vsyncadd (%p1905_p7), [#allocation6], 4294964224  ;;  %327 = vmatprep.mubr.f32.mxu0 %v1577_v0  ;;  %1264 = vmatprep.subr.mxu1 %v1577_v0  ;;  %v255_v4 = vld [vmem:[#allocation5 + $0x60] sm:$0xff]  ;;  %v254_v5 = vld [vmem:[#allocation5 + $0x58] sm:$0xff]  ;;  %s1579_s21 = smov 48   ;;  %s1580_s23 = smov 64  }
  0x58   : > { %279 = vmatprep.subr.mxu0 %v258_v1  ;;  %v253_v6 = vld [vmem:[#allocation5 + $0x50] sm:$0xff]  ;;  %v252_v7 = vld [vmem:[#allocation5 + $0x48] sm:$0xff]  ;;  %v251_v8 = vld [vmem:[#allocation5 + $0x40] sm:$0xff]  ;;  %1266 = vmatprep.mubr.msk.f32.mxu1 %vm1578_vm1, %v1577_v0  ;;  %vm343_vm2 = vcmask 130048   ;;  %v335_v22 = vshrl.u32 %v334_v21, 7  ;;  %v337_v23 = vand.u32 127, %v334_v21 }
  0x59   : > { %280 = vmatpush1.msra.mxu0 %v257_v2  ;;  %v250_v9 = vld [vmem:[#allocation5 + $0x38] sm:$0xff]  ;;  %v249_v10 = vld [vmem:[#allocation5 + $0x30] sm:$0xff]  ;;  %v248_v11 = vld [vmem:[#allocation5 + $0x28] sm:$0xff]  ;;  %v1581_v24 = vmov -1e+30   ;;  %vm418_vm4 = vcmask 64512  }
  0x5a   : > { %281 = vmatprep.subr.mxu0 %v256_v3  ;;  %v247_v12 = vld [vmem:[#allocation5 + $0x20] sm:$0xff]  ;;  %v246_v13 = vld [vmem:[#allocation5 + $0x18] sm:$0xff]  ;;  %v245_v14 = vld [vmem:[#allocation5 + $0x10] sm:$0xff]  ;;  %vm338_vm3 = vcmp.ge.s32.totalorder %v335_v22, %v337_v23  ;;  %s1582_s5 = smov 112   ;;  %s1583_s7 = smov 96   ;;  %vm1012_vm5 = vcmask 261120  }
  0x5b   : > { %282 = vmatpush1.msra.mxu0 %v255_v4  ;;  %v244_v15 = vld [vmem:[#allocation5 + $0x8] sm:$0xff]  ;;  %v243_v16 = vld [vmem:[#allocation5] sm:$0xff]  ;;  %v242_v17 = vld [vmem:[%s1737_s12] sm:$0xff]  ;;  %v1771_v25 = vsel %vm338_vm3, 0.0, %v1581_v24  ;;  %s1584_s8 = smov 32   ;;  %s1585_s9 = smov 80  }
  0x5c   : > { %283 = vmatprep.subr.mxu0 %v254_v5  ;;  %s1586_s14 = smov 16   ;;  %vm1014_vm6 = vcmask 392192   ;;  %s1236_s28 = sshll.u32 %s1634_s19, 7 }
  0x5d   : > { %284 = vmatpush1.msra.mxu0 %v253_v6  ;;  %s241_s26 = scalar_lea.vmem [#allocation8], %s1216_s10  ;;  %s1848_s12 = scalar_lea.hbm %s1890_s4, %s1236_s28 }
  0x5e   : > { %285 = vmatprep.subr.mxu0 %v252_v7  ;;  %s1119_s29 = sshll.u32 %s241_s26, 4  ;;  %p1906_p0 = scmp.ne.s32.totalorder %s1900_s25, 0  ;;  %s1120_s29 = int_to_ptr.vmem [resolvable:$true] %s1119_s29 }
  0x5f   : > { %286 = vmatpush1.msra.mxu0 %v251_v8  ;;  %s1587_s19 = smov [#allocation8]  }
  0x60   : > { %287 = vmatprep.subr.mxu0 %v250_v9  ;;  %s1504_s10 = sshll.u32 %s1587_s19, 4  ;;  %s1505_s10 = int_to_ptr.vmem [resolvable:$false] %s1504_s10 }
  0x61   : > { %288 = vmatpush1.msra.mxu0 %v249_v10  ;;  %p1507_p6 = scmp.lt.s32.totalorder %s1120_s29, %s1505_s10 }
  0x62   : > { %289 = vmatprep.subr.mxu0 %v248_v11 }
  0x63   : > { %290 = vmatpush1.msra.mxu0 %v247_v12 }
  0x64   : > { %291 = vmatprep.subr.mxu0 %v246_v13 }
  0x65   : > { %292 = vmatpush1.msra.mxu0 %v245_v14 }
  0x66   : > { %293 = vmatprep.subr.mxu0 %v244_v15 }
  0x67   : > { %294 = vmatpush1.msra.mxu0 %v243_v16 }
  0x68   : > { %1220 = vmatmul.mubr.msk.f32.vlgmr.msra.gmra.mxu0 %vm259_vm0, %v242_v17  ;;  %1304 = vmatprep.subr.mxu0 %v1577_v0 }
  0x69   : > { %1320 = vmatprep.mubr.msk.f32.mxu0 %vm1578_vm1, %v1577_v0 }
 0x128   : > { %v1756_v18 = vpop.f32.mrf.mxu0 }
 0x129   : > { %505 = vrot.lane.b32.xlu1 %v1756_v18, %s1579_s21  ;;  %341 = vrot.lane.b32.xlu0 %v1756_v18, %s1580_s23  ;;  %s1500_s23 = scalar_lea.vmem %s1120_s29, 128 }
 0x12a   : > { %v1763_v20 = vpop.f32.mrf.mxu0  ;;  %p1501_p11 = scmp.ne.s32.totalorder %s1120_s29, %s1500_s23 }
 0x12c   : > { %p1502_p1 = pnand %p1501_p11, %p1906_p0 }
 0x12e   : > { %p1503_p2 = pneg %p1502_p1 }
 0x19b   : > { %v342_v19 = vpop.permute.xlu0 %341  ;;  %v506_v35 = vpop.permute.xlu1 %505 }
 0x19c   : > { %1265 = vmatpush3.xpose.msk.msra.mxu1 %vm343_vm2, %v342_v19 }
 0x19d   : > { %1269 = vmatprep.subr.mxu1 %v1577_v0 }
 0x19f   : > { %1267 = vmatmul.mubr.msk.f32.vlgmr.msra.gmra.mxu1 %vm343_vm2, %v1756_v18 }
 0x1a0   : > { %1270 = vmatpush3.msra.mxu1 %v1763_v20  ;;  %1271 = vmatprep.mubr.msk.f32.mxu1 %vm1578_vm1, %v1577_v0 }
 0x1a1   : > { %1274 = vmatprep.subr.mxu1 %v1577_v0 }
 0x25f   : > { %v414_v26 = vpop.f32.mrf.mxu1 }
 0x260   : > { %v415_v27 = vadd.f32 %v414_v26, %v1771_v25 }
 0x261   : > { %v1268_v28 = vpop.f32.mrf.mxu1 }
 0x262   : > { %v419_v29 = vsel %vm418_vm4, %v415_v27, -inf  ;;  %v1021_v28 = vld [vmem:[#allocation7 + $0x28] sm:$0xff] }
 0x263   : > { %420 = vmax.xlane.f32.xlu0 %v419_v29  ;;  %v1020_v29 = vld [vmem:[#allocation7 + $0x20] sm:$0xff] }
 0x279   : > { %593 = vrot.lane.b32.xlu0 %v1763_v20, %s1582_s5 }
 0x2ec   : > { %v421_v30 = vpop.xlane.xlu0 %420 }
 0x2ed   : > { %v422_v31 = vsub.f32 %v415_v27, %v421_v30  ;;  %v1022_v27 = vld [vmem:[#allocation7 + $0x30] sm:$0xff]  ;;  %v1019_v30 = vld [vmem:[#allocation7 + $0x18] sm:$0xff] }
 0x2ef   : > { %v423_v32 = vmul.f32 1.442695, %v422_v31  ;;  %v1018_v31 = vld [vmem:[#allocation7 + $0x10] sm:$0xff] }
 0x2f0   : > { %v594_v40 = vpop.permute.xlu0 %593 }
 0x2f1   : > { %1404 = vpow2.f32 %v423_v32  ;;  %v1017_v32 = vld [vmem:[#allocation7 + $0x8] sm:$0xff] }
 0x2fe   : > { %v1405_v33 = vpop.eup %1404 }
 0x2ff   : > { %v425_v34 = vsel %vm418_vm4, %v1405_v33, 0.0 }
 0x300   : > { %426 = vadd.xlane.f32.xlu1 %v425_v34 }
 0x311   : > { %503 = vrot.lane.b32.xlu1 %v1756_v18, %s1582_s5  ;;  %s1506_s5 = scalar_lea.vmem %s1505_s10, 256 }
 0x312   : > { %p1508_p12 = scmp.lt.s32.totalorder %s1506_s5, %s1500_s23 }
 0x314   : > { %p1509_p3 = por %p1508_p12, %p1507_p6 }
 0x316   : > { %p1510_p9 = pnand %p1509_p3, %p1503_p2 }
 0x389   : > { %v427_v36 = vpop.xlane.xlu1 %426 }
 0x38a   : > { %1406 = vrcp.f32 %v427_v36 }
 0x38d   : > { %v504_v39 = vpop.permute.xlu1 %503 }
 0x397   : > { %v1407_v37 = vpop.eup %1406 }
 0x398   : > { %v429_v38 = vmul.f32 %v1407_v37, %v1405_v33  ;;  %v1016_v33 = vld [vmem:[#allocation7] sm:$0xff] }
 0x39a   : > { %1272 = vmatmul.mubr.msk.f32.vlgmr.msra.gmra.mxu1 %vm418_vm4, %v429_v38 }
 0x39b   : > { %1275 = vmatpush3.xpose.msk.msra.mxu1 %vm343_vm2, %v506_v35  ;;  %1276 = vmatprep.mubr.msk.f32.mxu1 %vm1578_vm1, %v1577_v0 }
 0x39c   : > { %1279 = vmatprep.subr.mxu1 %v1577_v0 }
 0x39e   : > { %1277 = vmatmul.mubr.msk.f32.vlgmr.msra.gmra.mxu1 %vm343_vm2, %v504_v39 }
 0x39f   : > { %1280 = vmatpush3.msra.mxu1 %v594_v40  ;;  %1281 = vmatprep.mubr.msk.f32.mxu1 %vm1578_vm1, %v1577_v0 }
 0x3a0   : > { %1284 = vmatprep.subr.mxu1 %v1577_v0 }
 0x45a   : > { %v1787_v41 = vpop.f32.mrf.mxu1 }
 0x45c   : > { %v1273_v42 = vpop.f32.mrf.mxu1 }
 0x45d   : > { %v1233_v42 = vld [vmem:[%s1889_s3] ss:$0 sm:$0xff] }
 0x45e   : > { %v577_v43 = vpop.f32.mrf.mxu1 }
 0x45f   : > { %v578_v44 = vadd.f32 %v577_v43, %v1771_v25 }
 0x460   : > { %v1278_v45 = vpop.f32.mrf.mxu1 }
 0x461   : > { %v581_v46 = vsel %vm418_vm4, %v578_v44, -inf }
 0x462   : > { %582 = vmax.xlane.f32.xlu1 %v581_v46 }
 0x473   : > { %669 = vrot.lane.b32.xlu1 %v1756_v18, %s1583_s7 }
 0x4eb   : > { %v583_v47 = vpop.xlane.xlu1 %582 }
 0x4ec   : > { %v584_v48 = vsub.f32 %v578_v44, %v583_v47 }
 0x4ee   : > { %v585_v49 = vmul.f32 1.442695, %v584_v48 }
 0x4ef   : > { %v670_v56 = vpop.permute.xlu1 %669 }
 0x4f0   : > { %1408 = vpow2.f32 %v585_v49 }
 0x4fd   : > { %v1409_v50 = vpop.eup %1408 }
 0x4fe   : > { %v587_v51 = vsel %vm418_vm4, %v1409_v50, 0.0 }
 0x4ff   : > { %588 = vadd.xlane.f32.xlu0 %v587_v51 }
 0x515   : > { %671 = vrot.lane.b32.xlu0 %v1756_v18, %s1584_s8 }
 0x588   : > { %v589_v52 = vpop.xlane.xlu0 %588 }
 0x589   : > { %1410 = vrcp.f32 %v589_v52 }
 0x58c   : > { %v672_v55 = vpop.permute.xlu0 %671 }
 0x596   : > { %v1411_v53 = vpop.eup %1410 }
 0x597   : > { %v591_v54 = vmul.f32 %v1411_v53, %v1409_v50 }
 0x599   : > { %1282 = vmatmul.mubr.msk.f32.vlgmr.msra.gmra.mxu1 %vm418_vm4, %v591_v54 }
 0x59a   : > { %1285 = vmatpush3.xpose.msk.msra.mxu1 %vm343_vm2, %v672_v55  ;;  %1286 = vmatprep.mubr.msk.f32.mxu1 %vm1578_vm1, %v1577_v0 }
 0x59b   : > { %1289 = vmatprep.subr.mxu1 %v1577_v0 }
 0x59d   : > { %1287 = vmatmul.mubr.msk.f32.vlgmr.msra.gmra.mxu1 %vm343_vm2, %v670_v56 }
 0x59e   : > { %1291 = vmatprep.mubr.msk.f32.mxu1 %vm1578_vm1, %v1577_v0 }
 0x659   : > { %v665_v57 = vpop.f32.mrf.mxu1 }
 0x65b   : > { %v1283_v58 = vpop.f32.mrf.mxu1 }
 0x65d   : > { %v743_v59 = vpop.f32.mrf.mxu1 }
 0x65e   : > { %v744_v60 = vadd.f32 %v743_v59, %v1771_v25 }
 0x65f   : > { %v1288_v61 = vpop.f32.mrf.mxu1 }
 0x660   : > { %v747_v62 = vsel %vm418_vm4, %v744_v60, -inf }
 0x661   : > { %748 = vmax.xlane.f32.xlu0 %v747_v62 }
 0x677   : > { %758 = vrot.lane.b32.xlu0 %v1763_v20, %s1583_s7 }
 0x67b   : > { %834 = vrot.lane.b32.xlu0 %v1756_v18, %s1585_s9 }
 0x6ea   : > { %v749_v63 = vpop.xlane.xlu0 %748 }
 0x6eb   : > { %v750_v1 = vsub.f32 %v744_v60, %v749_v63 }
 0x6ed   : > { %v751_v2 = vmul.f32 1.442695, %v750_v1 }
 0x6ee   : > { %v759_v3 = vpop.permute.xlu0 %758 }
 0x6ef   : > { %1412 = vpow2.f32 %v751_v2  ;;  %1290 = vmatpush3.msra.mxu1 %v759_v3 }
 0x6f0   : > { %1294 = vmatprep.subr.mxu1 %v1577_v0 }
 0x6f2   : > { %v835_v10 = vpop.permute.xlu0 %834 }
 0x6fc   : > { %v1413_v4 = vpop.eup %1412 }
 0x6fd   : > { %v753_v5 = vsel %vm418_vm4, %v1413_v4, 0.0 }
 0x6fe   : > { %754 = vadd.xlane.f32.xlu1 %v753_v5 }
 0x70f   : > { %836 = vrot.lane.b32.xlu1 %v1756_v18, %s1586_s14 }
 0x787   : > { %v755_v6 = vpop.xlane.xlu1 %754 }
 0x788   : > { %1414 = vrcp.f32 %v755_v6 }
 0x78b   : > { %v837_v9 = vpop.permute.xlu1 %836 }
 0x795   : > { %v1415_v7 = vpop.eup %1414 }
 0x796   : > { %v757_v8 = vmul.f32 %v1415_v7, %v1413_v4 }
 0x798   : > { %1292 = vmatmul.mubr.msk.f32.vlgmr.msra.gmra.mxu1 %vm418_vm4, %v757_v8 }
 0x799   : > { %1295 = vmatpush3.xpose.msk.msra.mxu1 %vm343_vm2, %v837_v9  ;;  %1296 = vmatprep.mubr.msk.f32.mxu1 %vm1578_vm1, %v1577_v0 }
 0x79a   : > { %1299 = vmatprep.subr.mxu1 %v1577_v0 }
 0x79c   : > { %1297 = vmatmul.mubr.msk.f32.vlgmr.msra.gmra.mxu1 %vm343_vm2, %v835_v10 }
 0x79d   : > { %1301 = vmatprep.mubr.msk.f32.mxu1 %vm1578_vm1, %v1577_v0 }
 0x858   : > { %v830_v11 = vpop.f32.mrf.mxu1 }
 0x85a   : > { %v1293_v12 = vpop.f32.mrf.mxu1 }
 0x85c   : > { %v908_v13 = vpop.f32.mrf.mxu1 }
 0x85d   : > { %v909_v14 = vadd.f32 %v908_v13, %v1771_v25 }
 0x85e   : > { %v1298_v15 = vpop.f32.mrf.mxu1 }
 0x85f   : > { %v912_v16 = vsel %vm418_vm4, %v909_v14, -inf }
 0x860   : > { %913 = vmax.xlane.f32.xlu0 %v912_v16 }
 0x876   : > { %923 = vrot.lane.b32.xlu0 %v1763_v20, %s1585_s9  ;;  %v1023_v20 = vld [vmem:[#allocation7 + $0x38] sm:$0xff] }
 0x877   : > { %1305 = vmatpush3.msra.mxu0 %v1023_v20 }
 0x878   : > { %1306 = vmatprep.subr.mxu0 %v1577_v0 }
 0x879   : > { %1307 = vmatpush3.msra.mxu0 %v1022_v27 }
 0x87a   : > { %1004 = vrot.lane.b32.xlu0 %v830_v11, %s1584_s8  ;;  %1308 = vmatprep.subr.mxu0 %v1577_v0 }
 0x87b   : > { %1309 = vmatpush3.msra.mxu0 %v1021_v28 }
 0x87c   : > { %1310 = vmatprep.subr.mxu0 %v1577_v0 }
 0x87d   : > { %1311 = vmatpush3.msra.mxu0 %v1020_v29 }
 0x87e   : > { %1312 = vmatprep.subr.mxu0 %v1577_v0 }
 0x87f   : > { %1313 = vmatpush3.msra.mxu0 %v1019_v30 }
 0x880   : > { %1314 = vmatprep.subr.mxu0 %v1577_v0 }
 0x881   : > { %1315 = vmatpush3.msra.mxu0 %v1018_v31 }
 0x882   : > { %1316 = vmatprep.subr.mxu0 %v1577_v0 }
 0x883   : > { %1317 = vmatpush3.msra.mxu0 %v1017_v32 }
 0x884   : > { %1318 = vmatprep.subr.mxu0 %v1577_v0 }
 0x885   : > { %1319 = vmatpush3.msra.mxu0 %v1016_v33 }
 0x8e9   : > { %v914_v17 = vpop.xlane.xlu0 %913 }
 0x8ea   : > { %v915_v18 = vsub.f32 %v909_v14, %v914_v17 }
 0x8ec   : > { %v916_v19 = vmul.f32 1.442695, %v915_v18 }
 0x8ed   : > { %v924_v21 = vpop.permute.xlu0 %923 }
 0x8ee   : > { %1416 = vpow2.f32 %v916_v19  ;;  %1300 = vmatpush3.msra.mxu1 %v924_v21 }
 0x8f1   : > { %v1005_v37 = vpop.permute.xlu0 %1004 }
 0x8fb   : > { %v1417_v22 = vpop.eup %1416 }
 0x8fc   : > { %v918_v23 = vsel %vm418_vm4, %v1417_v22, 0.0 }
 0x8fd   : > { %919 = vadd.xlane.f32.xlu1 %v918_v23 }
 0x90e   : > { %1000 = vrot.lane.b32.xlu1 %v665_v57, %s1586_s14 }
 0x986   : > { %v920_v24 = vpop.xlane.xlu1 %919 }
 0x987   : > { %1418 = vrcp.f32 %v920_v24 }
 0x98a   : > { %v1001_v36 = vpop.permute.xlu1 %1000 }
 0x98b   : > { %v1011_v38 = vsel %vm343_vm2, %v1787_v41, %v1001_v36 }
 0x98c   : > { %v1013_v39 = vsel %vm1012_vm5, %v1011_v38, %v1005_v37 }
 0x994   : > { %v1419_v25 = vpop.eup %1418 }
 0x995   : > { %v922_v26 = vmul.f32 %v1419_v25, %v1417_v22 }
 0x997   : > { %1302 = vmatmul.mubr.msk.f32.vlgmr.msra.gmra.mxu1 %vm418_vm4, %v922_v26 }
 0xa57   : > { %v995_v34 = vpop.f32.mrf.mxu1 }
 0xa58   : > { %1008 = vrot.lane.b32.xlu0 %v995_v34, %s1579_s21  ;;  %s1106_s21 = scalar_lea.sflag [#allocation4], %s1731_s6 }
 0xa59   : > { %v1303_v35 = vpop.f32.mrf.mxu1 }
 0xaca   : > { %v1009_v40 = vpop.permute.xlu0 %1008 }
 0xacb   : > { %v1015_v0 = vsel %vm1014_vm6, %v1013_v39, %v1009_v40 }
 0xacc   : > { %1321 = vmatmul.mubr.msk.f32.vlgmr.msra.gmra.mxu0 %vm259_vm0, %v1015_v0 }
 0xb8c   : > { %v1100_v43 = vpop.f32.mrf.mxu0 }
 0xb8d   : > { %v1101_v44 = vadd.f32 %v1233_v42, %v1100_v43 }
 0xb8e   : > { %v1322_v41 = vpop.f32.mrf.mxu0 }
 0xb8f   : > { %1104 = vst.msk [vmem:[%s241_s26] sm:$0xff] %vm259_vm0, %v1101_v44 }
 0xb90   : > { %1513 = shalt.err (!%p1510_p9)
}
 0xb91   : > { %s1514_s7 = scalar_lea.hbm %s1848_s12, 128  ;;  %s1518_s9 = scalar_lea.hbm %s1890_s4, 256 }
 0xb92   : > { %p1515_p13 = scmp.ne.s32.totalorder %s1848_s12, %s1514_s7  ;;  %p1519_p4 = scmp.lt.s32.totalorder %s1848_s12, %s1890_s4 }
 0xb93   : > { %p1520_p8 = scmp.lt.s32.totalorder %s1518_s9, %s1514_s7 }
 0xb94   : > { %p1516_p5 = pnand %p1515_p13, %p1906_p0 }
 0xb95   : > { %p1521_p7 = por %p1520_p8, %p1519_p4 }
 0xb96   : > { %p1517_p10 = pneg %p1516_p5 }
 0xb98   : > { %p1522_p11 = pnand %p1521_p7, %p1517_p10 }
 0xb9a   : > { %1525 = shalt.err (!%p1522_p11)
}
 0xb9b   : > { %1333 = dma.vmem_to_hbm [thread:$0]  (%p1906_p0), %s1120_s29, 128, %s1848_s12, %s1106_s21  }
 0xb9c PF: > { %s1131_s27 = sand.u32 1, %s1556_s15   ;;  %p1907_p1 = scmp.ne.s32.totalorder %s1896_s22, 0 }
 0xb9d   : > { %p1908_p2 = scmp.ge.s32.totalorder %s1568_s18, 2  ;;  %s1132_s28 = scalar_lea.sflag [#allocation4], %s1131_s27 }
 0xb9f   : > { %p1347_p6 = pnand %p1908_p2, %p1907_p1 }
 0xba1   : > { %p1348_p12 = pneg %p1347_p6 }
 0xba3   : > { %1551 = dma.done.wait (%p1348_p12), %s1132_s28, 128  }
 0xba4   : > { %1553 = vsyncadd (%p1348_p12), %s1132_s28, 4294967168  ;;  %p18_p3 = scmp.ge.s32.totalorder %s1685_s13, 4   ;;  %s1909_s15 = smov %s1560_s16 }
 0xba5   : > { %s1910_s16 = smov %s1564_s17  ;;  %s1911_s17 = smov %s1694_s24 }
 0xba6   : > { %s1912_s18 = smov %s1685_s13  ;;  %20 = sbr.rel (!%p18_p3) target bundleno = 6 (0x6), region = 89 }
 0xbab   :  { %1137 = vsyncpa [#allocation3], 1 }
 0xbac   :  { %1139 = vsyncpa [#allocation3 + $0x1], 1 }
 0xbad   :  { %1140 = vsyncpa [#allocation6], 1 }
 0xbae   :  { %1141 = vsyncpa [#allocation4], 1 }
 0xbaf   :  { %1143 = vsyncpa [#allocation4 + $0x1], 1 }

</bundles_post_ra>
